<compile_context>
chip_gen: v5e
topology: v5e:2x2
jax: 0.10.0
libtpu: 0.0.40
codegen_flags: <defaults>
</compile_context>

<pallas_src>
import functools
import math

import jax
import jax.numpy as jnp
from jax.experimental import pallas as pl
from jax.experimental.pallas import tpu as pltpu

_TARGET_BLOCK_BYTES = 2 * 1024 * 1024  # per-input, f32-equivalent


def _cdiv(a, b):
    return -(-a // b)


def _round_up(a, b):
    return _cdiv(a, b) * b


def _bce_partial_kernel(pred_ref, target_ref, out_ref, *, block_rows,
                        total_rows, ragged):
    """One grid step: clamped-BCE partial sums over a (block_rows, C) block.

    Writes an (8, C) block whose row 0 holds per-lane partial sums; rows 1..7
    are zeroed so the epilogue can simply jnp.sum the whole output.
    """
    p = pred_ref[...].astype(jnp.float32)
    t = target_ref[...].astype(jnp.float32)

    neg_hundred = jnp.float32(-100.0)  # PyTorch clamps log outputs at -100
    log_p = jnp.maximum(jnp.log(p), neg_hundred)
    log_1mp = jnp.maximum(jnp.log(1.0 - p), neg_hundred)
    term = t * log_p + (1.0 - t) * log_1mp

    def write(block_term):
        out_ref[...] = jnp.zeros_like(out_ref)
        out_ref[0:1, :] = jnp.sum(block_term, axis=0, keepdims=True)

    if not ragged:
        write(term)
    else:
        i = pl.program_id(0)
        last = pl.num_programs(0) - 1

        @pl.when(i < last)
        def _():
            write(term)

        @pl.when(i == last)
        def _():
            # Tail block only: out-of-bounds rows hold clamped/stale data
            # (possibly NaN after the logs); the select swallows them.
            valid = total_rows - i * block_rows
            row = jax.lax.broadcasted_iota(jnp.int32, term.shape, 0)
            write(jnp.where(row < valid, term, jnp.float32(0.0)))


def bce_loss(pred, target):
    """Pallas TPU BCELoss (mean reduction) forward. Returns a scalar float32."""
    assert pred.shape == target.shape
    assert pred.ndim >= 1
    total = math.prod(pred.shape)

    # Merge leading dims only; the minor (lane) dim is untouched, so no
    # lane-crossing relayout / pad copy is introduced in the wrapper.
    if pred.ndim >= 2:
        rows = math.prod(pred.shape[:-1])
        cols = pred.shape[-1]
    else:
        rows, cols = 1, pred.shape[0]
    p2 = pred.reshape(rows, cols)
    t2 = target.reshape(rows, cols)

    # Row-block sizing: <= _TARGET_BLOCK_BYTES per f32 input block, multiple
    # of 8 sublanes (or full extent), and >= ~4 grid steps when possible so
    # the pipeline overlaps and both v7x TensorCores get work.
    cap_rows = max(8, ((_TARGET_BLOCK_BYTES // (cols * 4)) // 8) * 8)
    if rows <= 8:
        block_rows = rows
    elif rows <= cap_rows:
        tiles = min(4, rows // 8)
        block_rows = _round_up(_cdiv(rows, tiles), 8)
        if block_rows >= rows:
            block_rows = rows
    else:
        block_rows = cap_rows

    num_tiles = _cdiv(rows, block_rows)
    ragged = (rows % block_rows) != 0

    kernel = functools.partial(
        _bce_partial_kernel,
        block_rows=block_rows,
        total_rows=rows,
        ragged=ragged,
    )

    grid_spec = pltpu.PrefetchScalarGridSpec(
        num_scalar_prefetch=0,
        grid=(num_tiles,),
        in_specs=[
            pl.BlockSpec((block_rows, cols), lambda i: (i, 0)),
            pl.BlockSpec((block_rows, cols), lambda i: (i, 0)),
        ],
        # (8, cols) output blocks stay (8,128)-tile friendly even for
        # num_tiles > 1 (a (1, cols) block would violate the sublane rule).
        out_specs=pl.BlockSpec((None, 8, cols), lambda i: (i, 0, 0)),
    )

    partial_sums = pl.pallas_call(
        kernel,
        out_shape=jax.ShapeDtypeStruct((num_tiles, 8, cols), jnp.float32),
        grid_spec=grid_spec,
        compiler_params=pltpu.CompilerParams(
            dimension_semantics=("parallel",),
        ),
    )(p2, t2)

    # Tiny epilogue: cross-lane / cross-tile sum and the mean over ALL
    # elements (the (size, -1) view in the PyTorch module doesn't change it).
    return -(jnp.sum(partial_sums) / jnp.float32(total))


def bce_loss_ref(pred, target):
    """Pure-JAX reference mirroring PyTorch nn.BCELoss (mean, log clamp -100)."""
    size = pred.shape[0]
    p = pred.reshape(size, -1).astype(jnp.float32)
    t = target.reshape(size, -1).astype(jnp.float32)
    log_p = jnp.maximum(jnp.log(p), -100.0)
    log_1mp = jnp.maximum(jnp.log(1.0 - p), -100.0)
    return -jnp.mean(t * log_p + (1.0 - t) * log_1mp)


if __name__ == "__main__":
    key = jax.random.PRNGKey(0)
    k1, k2, k3, k4 = jax.random.split(key, 4)

    # Case 1: NCHW mask-style inputs -> rows=128, cols=16, 4 parallel tiles.
    B, C, H, W = 2, 4, 16, 16
    pred = jax.nn.sigmoid(jax.random.normal(k1, (B, C, H, W), dtype=jnp.float32))
    target = (jax.random.uniform(k2, (B, C, H, W)) > 0.5).astype(jnp.float32)
    loss = jax.block_until_ready(bce_loss(pred, target))
    ref = jax.block_until_ready(bce_loss_ref(pred, target))
    assert jnp.allclose(loss, ref, atol=1e-5, rtol=1e-5), (loss, ref)

    # Case 2: ragged row count -> exercises the pl.when-gated tail mask.
    pred2 = jax.nn.sigmoid(jax.random.normal(k3, (5, 10, 20), dtype=jnp.float32))
    target2 = (jax.random.uniform(k4, (5, 10, 20)) > 0.5).astype(jnp.float32)
    loss2 = jax.block_until_ready(bce_loss(pred2, target2))
    ref2 = jax.block_until_ready(bce_loss_ref(pred2, target2))
    assert jnp.allclose(loss2, ref2, atol=1e-5, rtol=1e-5), (loss2, ref2)

    print("KERNEL_OK")
</pallas_src>

<mosaic_0001>
module attributes {stable_mosaic.version = 11 : i64} {
  func.func @_bce_partial_kernel(%arg0: i32, %arg1: memref<32x16xf32, #tpu.memory_space<vmem>>, %arg2: memref<32x16xf32, #tpu.memory_space<vmem>>, %arg3: memref<1x8x16xf32, #tpu.memory_space<vmem>>) attributes {dimension_semantics = [#tpu.dimension_semantics<parallel>], iteration_bounds = array<i64: 4>, scalar_prefetch = 0 : i64, scratch_operands = 0 : i64, tpu.core_type = #tpu.core_type<tc>, window_params = [{transform_indices = @transform_0, window_bounds = array<i64: 32, 16>}, {transform_indices = @transform_1, window_bounds = array<i64: 32, 16>}, {transform_indices = @transform_2, window_bounds = array<i64: 1, 8, 16>}]} {
    %c0 = arith.constant 0 : index
    %c0_0 = arith.constant 0 : index
    %0 = vector.load %arg1[%c0, %c0_0] : memref<32x16xf32, #tpu.memory_space<vmem>>, vector<32x16xf32>
    %c0_1 = arith.constant 0 : index
    %c0_2 = arith.constant 0 : index
    %1 = vector.load %arg2[%c0_1, %c0_2] : memref<32x16xf32, #tpu.memory_space<vmem>>, vector<32x16xf32>
    %2 = math.log %0 : vector<32x16xf32>
    %cst = arith.constant -1.000000e+02 : f32
    %3 = vector.broadcast %cst : f32 to vector<32x16xf32>
    %4 = arith.maximumf %2, %3 : vector<32x16xf32>
    %cst_3 = arith.constant 1.000000e+00 : f32
    %5 = vector.broadcast %cst_3 : f32 to vector<32x16xf32>
    %6 = arith.subf %5, %0 : vector<32x16xf32>
    %7 = math.log %6 : vector<32x16xf32>
    %cst_4 = arith.constant -1.000000e+02 : f32
    %8 = vector.broadcast %cst_4 : f32 to vector<32x16xf32>
    %9 = arith.maximumf %7, %8 : vector<32x16xf32>
    %10 = arith.mulf %1, %4 : vector<32x16xf32>
    %cst_5 = arith.constant 1.000000e+00 : f32
    %11 = vector.broadcast %cst_5 : f32 to vector<32x16xf32>
    %12 = arith.subf %11, %1 : vector<32x16xf32>
    %13 = arith.mulf %12, %9 : vector<32x16xf32>
    %14 = arith.addf %10, %13 : vector<32x16xf32>
    %cst_6 = arith.constant 0.000000e+00 : f32
    %15 = vector.broadcast %cst_6 : f32 to vector<8x16xf32>
    %c0_7 = arith.constant 0 : index
    %c0_8 = arith.constant 0 : index
    %c0_9 = arith.constant 0 : index
    %16 = vector.load %arg3[%c0_7, %c0_8, %c0_9] : memref<1x8x16xf32, #tpu.memory_space<vmem>>, vector<1x8x16xf32>
    %17 = vector.shape_cast %16 : vector<1x8x16xf32> to vector<8x16xf32>
    %18 = vector.shape_cast %15 : vector<8x16xf32> to vector<1x8x16xf32>
    tpu.vector_store %arg3[%c0_7, %c0_8, %c0_9], %18 {strides = array<i32>} : memref<1x8x16xf32, #tpu.memory_space<vmem>>, vector<1x8x16xf32>,
    %cst_10 = arith.constant dense<0.000000e+00> : vector<16xf32>
    %19 = vector.multi_reduction <add>, %14, %cst_10 [0] : vector<32x16xf32> to vector<16xf32>
    %20 = vector.shape_cast %19 : vector<16xf32> to vector<1x16xf32>
    %c0_11 = arith.constant 0 : index
    %c0_12 = arith.constant 0 : index
    %c0_13 = arith.constant 0 : index
    %21 = vector.load %arg3[%c0_11, %c0_12, %c0_13] : memref<1x8x16xf32, #tpu.memory_space<vmem>>, vector<1x1x16xf32>
    %22 = vector.shape_cast %21 : vector<1x1x16xf32> to vector<1x16xf32>
    %23 = vector.shape_cast %20 : vector<1x16xf32> to vector<1x1x16xf32>
    tpu.vector_store %arg3[%c0_11, %c0_12, %c0_13], %23 {strides = array<i32>} : memref<1x8x16xf32, #tpu.memory_space<vmem>>, vector<1x1x16xf32>,
    return
  }
  func.func @transform_0(%arg0: i32) -> (i32, i32) {
    %c0_i32 = arith.constant 0 : i32
    %c0_i32_0 = arith.constant 0 : i32
    return %arg0, %c0_i32 : i32, i32
  }
  func.func @transform_1(%arg0: i32) -> (i32, i32) {
    %c0_i32 = arith.constant 0 : i32
    %c0_i32_0 = arith.constant 0 : i32
    return %arg0, %c0_i32 : i32, i32
  }
  func.func @transform_2(%arg0: i32) -> (i32, i32, i32) {
    %c0_i32 = arith.constant 0 : i32
    %c0_i32_0 = arith.constant 0 : i32
    %c0_i32_1 = arith.constant 0 : i32
    return %arg0, %c0_i32, %c0_i32_0 : i32, i32, i32
  }
}

</mosaic_0001>

<bundles_post_ra>
// kernel: tpu_custom_call.1
= control target key start
LH: loop header
LB: loop body
LE: loop exit
PB: predicated region body
PF: predicated region fallthrough
CT: control target
= control target key end

     0   :  { %7 = vsyncpa [#allocation3], 0  ;;  %s572_s0 = inlined_call_operand.vmem [shape: f32[128,16], index: 0, kind: input, shape index: {}]   ;;  %s573_s1 = inlined_call_operand.vmem [shape: f32[128,16], index: 1, kind: input, shape index: {}]   ;;  %s574_s2 = inlined_call_operand.hbm [shape: f32[4,8,16], index: 2, kind: output, shape index: {}]  }
   0x1   :  { %9 = vsyncpa [#allocation3 + $0x1], 0  ;;  %s471_s9 = smov 0   ;;  %s473_s10 = smov 0  }
   0x2   :  { %s475_s11 = smov 0   ;;  %s477_s12 = smov 0  }
   0x3 LB: > { %s492_s13 = sadd.s32 4294967295, %s453_s12   ;;  %s322_s14 = sadd.s32 4294967294, %s453_s12   ;;  %s453_s12 = sphi %s477_s12, %s580_s12   ;;  %s449_s11 = sphi %s475_s11, %s579_s11   ;;  %s445_s10 = sphi %s473_s10, %s578_s10   ;;  %s441_s9 = sphi %s471_s9, %s577_s9  }
   0x4   : > { %s496_s15 = sadd.s32 1, %s453_s12   ;;  %s74_s16 = sadd.s32 1, %s449_s11 }
   0x5   : > { %s71_s17 = ssub.s32 %s453_s12, %s496_s15  ;;  %p84_p0 = scmp.ne.s32.totalorder %s449_s11, %s445_s10 }
   0x6   : > { %p72_p1 = scmp.eq.s32.totalorder %s71_s17, 0  ;;  %p85_p2 = scmp.eq.s32.totalorder %s492_s13, 3 }
   0x7   : > { %p90_p3 = scmp.ne.s32.totalorder %s445_s10, %s441_s9  ;;  %p91_p4 = scmp.eq.s32.totalorder %s322_s14, 3 }
   0x8   : > { %s507_s18 = scalar_select %p72_p1, %s449_s11, %s74_s16  }
   0x9   : > { %p509_p5 = por %p85_p2, %p84_p0  ;;  %p513_p6 = por %p91_p4, %p90_p3 }
   0xa   : > { %p325_p7 = scmp.ge.s32.totalorder %s453_s12, 1  ;;  %p127_p8 = scmp.lt.s32.totalorder %s453_s12, 5 }
   0xc   : > { %p128_p9 = pnand %p325_p7, %p127_p8 }
   0xd   : > { %s151_s21 = sand.u32 (!%p128_p9), 1, %s445_s10   ;;  %s327_s22 = sshll.u32 (!%p128_p9), %s492_s13, 2 }
   0xe   : > { %131 = sbr.rel (%p128_p9) target bundleno = 65 (0x41), region = 28  ;;  %s326_s23 = sshll.u32 (!%p128_p9), %s151_s21, 3 }
   0xf   : > { %p155_p10 = scmp.lt.s32.totalorder (!%p128_p9), %s327_s22, 15  ;;  %s523_s24 = scalar_lea.vmem (!%p128_p9), [#allocation2], %s326_s23 }
  0x10   : > { %s332_s4 = sshll.u32 (!%p128_p9), %s492_s13, 3  ;;  %s248_s8 = sshll.u32 (!%p128_p9), %s523_s24, 4  ;;  %s249_s8 = int_to_ptr.vmem [resolvable:$true] %s248_s8 }
  0x11   : > { %s246_s7 = scalar_lea.hbm (!%p128_p9), %s574_s2, %s332_s4  ;;  %s236_s16 = scalar_lea.sflag (!%p128_p9), [#allocation3], %s151_s21 }
  0x12   : > { %s250_s14 = sshll.u32 (!%p128_p9), %s246_s7, 4  ;;  %s251_s14 = int_to_ptr.hbm [resolvable:$true] %s250_s14 }
  0x13   : > { %vm218_vm0 = vcmask 130048   ;;  %s582_s22 = smov (!%p155_p10, %s327_s22), 15  ;;  %v455_v0 = vmov 0.0   ;;  %vm233_vm1 = vcmask 122880   ;;  %s405_s17 = sshra.s32 %s251_s14, 4  ;;  %s406_s17 = int_to_ptr.hbm [resolvable:$true] %s405_s17 }
  0x14   : > { %219 = vst.msk [vmem:[%s523_s24] sm:$0xff] %vm218_vm0, %v455_v0  ;;  %s328_s25 = sshll.u32 %s582_s22, 3  ;;  %s407_s13 = scalar_lea.hbm %s406_s17, 8 }
  0x15   : > { %s158_s28 = scalar_lea.vmem %s572_s0, %s328_s25  ;;  %s164_s3 = scalar_lea.vmem %s573_s1, %s328_s25 }
  0x16   : > { %v166_v1 = vld [vmem:[%s158_s28] sm:$0xff]  ;;  %v167_v2 = vld [vmem:[%s158_s28 + $0x8] sm:$0xff]  ;;  %v168_v3 = vld [vmem:[%s158_s28 + $0x10] sm:$0xff]  ;;  %p408_p11 = scmp.ne.s32.totalorder %s406_s17, %s407_s13  ;;  %s411_s25 = scalar_lea.hbm %s574_s2, 32 }
  0x17   : > { %v169_v4 = vld [vmem:[%s158_s28 + $0x18] sm:$0xff]  ;;  %375 = vlog2.f32 %v166_v1  ;;  %v186_v5 = vsub.f32 1.0, %v166_v1  ;;  %v187_v6 = vsub.f32 1.0, %v167_v2  ;;  %v188_v7 = vsub.f32 1.0, %v168_v3  ;;  %v170_v13 = vld [vmem:[%s164_s3] sm:$0xff]  ;;  %v171_v16 = vld [vmem:[%s164_s3 + $0x8] sm:$0xff]  ;;  %p412_p0 = scmp.lt.s32.totalorder %s406_s17, %s574_s2  ;;  %p413_p1 = scmp.lt.s32.totalorder %s411_s25, %s407_s13 }
  0x18   : > { %377 = vlog2.f32 %v167_v2  ;;  %v189_v8 = vsub.f32 1.0, %v169_v4  ;;  %v172_v20 = vld [vmem:[%s164_s3 + $0x10] sm:$0xff]  ;;  %v173_v24 = vld [vmem:[%s164_s3 + $0x18] sm:$0xff]  ;;  %v206_v27 = vsub.f32 1.0, %v170_v13  ;;  %v207_v31 = vsub.f32 1.0, %v171_v16  ;;  %p409_p12 = pnand %p408_p11, %p509_p5 }
  0x19   : > { %379 = vlog2.f32 %v168_v3  ;;  %v208_v36 = vsub.f32 1.0, %v172_v20  ;;  %v209_v40 = vsub.f32 1.0, %v173_v24  ;;  %p414_p2 = por %p413_p1, %p412_p0 }
  0x1a   : > { %381 = vlog2.f32 %v169_v4  ;;  %p410_p13 = pneg %p409_p12 }
  0x1b   : > { %383 = vlog2.f32 %v186_v5 }
  0x1c   : > { %385 = vlog2.f32 %v187_v6  ;;  %p415_p3 = pnand %p414_p2, %p410_p13 }
  0x1d   : > { %v376_v9 = vpop.eup %375  ;;  %387 = vlog2.f32 %v188_v7 }
  0x1e   : > { %v378_v10 = vpop.eup %377  ;;  %v175_v11 = vmul.f32 0.6931472, %v376_v9  ;;  %389 = vlog2.f32 %v189_v8 }
  0x1f   : > { %v380_v12 = vpop.eup %379  ;;  %v177_v14 = vmul.f32 0.6931472, %v378_v10 }
  0x20   : > { %v382_v15 = vpop.eup %381  ;;  %v179_v17 = vmul.f32 0.6931472, %v380_v12  ;;  %v182_v18 = vmax.f32 %v175_v11, -100.0 }
  0x21   : > { %v384_v19 = vpop.eup %383  ;;  %v181_v21 = vmul.f32 0.6931472, %v382_v15  ;;  %v183_v22 = vmax.f32 %v177_v14, -100.0 }
  0x22   : > { %v386_v23 = vpop.eup %385  ;;  %v184_v25 = vmax.f32 %v179_v17, -100.0  ;;  %v191_v26 = vmul.f32 0.6931472, %v384_v19  ;;  %v202_v35 = vmul.f32 %v182_v18, %v170_v13 }
  0x23   : > { %v388_v28 = vpop.eup %387  ;;  %v185_v29 = vmax.f32 %v181_v21, -100.0  ;;  %v193_v30 = vmul.f32 0.6931472, %v386_v23  ;;  %v203_v39 = vmul.f32 %v183_v22, %v171_v16 }
  0x24   : > { %v390_v32 = vpop.eup %389  ;;  %v195_v33 = vmul.f32 0.6931472, %v388_v28  ;;  %v198_v34 = vmax.f32 %v191_v26, -100.0  ;;  %v204_v42 = vmul.f32 %v184_v25, %v172_v20 }
  0x25   : > { %v197_v37 = vmul.f32 0.6931472, %v390_v32  ;;  %v199_v38 = vmax.f32 %v193_v30, -100.0  ;;  %v205_v45 = vmul.f32 %v185_v29, %v173_v24 }
  0x26   : > { %v200_v41 = vmax.f32 %v195_v33, -100.0  ;;  %v210_v43 = vmul.f32 %v206_v27, %v198_v34 }
  0x27   : > { %v201_v44 = vmax.f32 %v197_v37, -100.0  ;;  %v211_v46 = vmul.f32 %v207_v31, %v199_v38 }
  0x28   : > { %v212_v47 = vmul.f32 %v208_v36, %v200_v41  ;;  %v214_v48 = vadd.f32 %v210_v43, %v202_v35 }
  0x29   : > { %v213_v49 = vmul.f32 %v209_v40, %v201_v44  ;;  %v215_v50 = vadd.f32 %v211_v46, %v203_v39 }
  0x2a   : > { %v216_v51 = vadd.f32 %v212_v47, %v204_v42  ;;  %v220_v52 = vsel %vm218_vm0, %v214_v48, 0.0 }
  0x2b   : > { %v217_v53 = vadd.f32 %v213_v49, %v205_v45  ;;  %v221_v54 = vsel %vm218_vm0, %v215_v50, 0.0 }
  0x2c   : > { %v222_v55 = vadd.f32 %v221_v54, %v220_v52  ;;  %v223_v56 = vsel %vm218_vm0, %v216_v51, 0.0 }
  0x2d   : > { %v225_v57 = vsel %vm218_vm0, %v217_v53, 0.0 }
  0x2e   : > { %v224_v58 = vadd.f32 %v223_v56, %v222_v55 }
  0x30   : > { %v226_v59 = vadd.f32 %v225_v57, %v224_v58 }
  0x32   : > { %v227_v60 = vrot.slane %v226_v59, 4 }
  0x34   : > { %v228_v61 = vadd.f32 %v227_v60, %v226_v59 }
  0x36   : > { %v229_v62 = vrot.slane %v228_v61, 2 }
  0x38   : > { %v230_v63 = vadd.f32 %v229_v62, %v228_v61 }
  0x3a   : > { %v231_v0 = vrot.slane %v230_v63, 1 }
  0x3c   : > { %v232_v1 = vadd.f32 %v231_v0, %v230_v63 }
  0x3e   : > { %234 = vst.msk [vmem:[%s523_s24] sm:$0x1] %vm233_vm1, %v232_v1 }
  0x3f   : > { %418 = shalt.err (!%p415_p3)
}
  0x40   : > { %335 = dma.vmem_to_hbm [thread:$0]  (%p509_p5), %s249_s8, 128, %s251_s14, %s236_s16  }
  0x41 PF: > { %p341_p4 = scmp.ge.s32.totalorder %s453_s12, 2  ;;  %s262_s21 = sand.u32 1, %s441_s9  }
  0x42   : > { %s263_s24 = scalar_lea.sflag [#allocation3], %s262_s21 }
  0x43   : > { %p338_p7 = pnand %p341_p4, %p513_p6 }
  0x45   : > { %p339_p8 = pneg %p338_p7 }
  0x47   : > { %436 = dma.done.wait (%p339_p8), %s263_s24, 128  }
  0x48   : > { %438 = vsyncadd (%p339_p8), %s263_s24, 4294967168  ;;  %p12_p9 = scmp.ge.s32.totalorder %s496_s15, 6   ;;  %s577_s9 = smov %s445_s10 }
  0x49   : > { %s578_s10 = smov %s449_s11  ;;  %s579_s11 = smov %s507_s18 }
  0x4a   : > { %s580_s12 = smov %s496_s15  ;;  %14 = sbr.rel (!%p12_p9) target bundleno = 3 (0x3), region = 66 }
  0x4f   :  { %269 = vsyncpa [#allocation3], 1 }
  0x50   :  { %271 = vsyncpa [#allocation3 + $0x1], 1 }

</bundles_post_ra>
